<compile_context>
chip_gen: v7x
topology: tpu7x:2x2x1
jax: 0.10.0
libtpu: 0.0.40
codegen_flags: <defaults>
</compile_context>

<pallas_src>
import functools

import jax
import jax.numpy as jnp
from jax import lax
from jax.experimental import pallas as pl
from jax.experimental.pallas import tpu as pltpu

LANE = 128


def _round_up(n, m):
    return -(-n // m) * m


# ---------------------------------------------------------------------------
# Weight preparation: done ONCE, never on the per-step path.
# ---------------------------------------------------------------------------
def prepare_weights(w_i2h, b_i2h, w_i2o, b_i2o, input_size, hidden_size):
    """PyTorch layout in: w_i2h (H, I+H), w_i2o (O, I+H), biases (H,), (O,).

    Returns fused, transposed, lane-padded weights:
      wx (I, P), wh (P, P), b (1, P)   with P = round_up(H + O, 128).
    Columns [0,H) produce the new hidden, [H,H+O) the output logits, the rest
    are zero padding.  Rows H..P-1 of wh are zero so the carried 128-lane
    hidden slab can be fed back without slicing.
    """
    H = hidden_size
    HPO = w_i2h.shape[0] + w_i2o.shape[0]
    P = _round_up(HPO, LANE)

    w_cat_t = jnp.concatenate([w_i2h, w_i2o], axis=0).T        # (I+H, H+O)
    wx = w_cat_t[:input_size]                                   # (I, H+O)
    wh = w_cat_t[input_size:]                                   # (H, H+O)
    b = jnp.concatenate([b_i2h, b_i2o]).reshape(1, -1)          # (1, H+O)

    wx = jnp.pad(wx, ((0, 0), (0, P - HPO)))                    # (I, P)
    wh = jnp.pad(wh, ((0, P - H), (0, P - HPO)))                # (P, P), zero rows >= H
    b = jnp.pad(b, ((0, 0), (0, P - HPO)))                      # (1, P)
    return wx, wh, b


# ---------------------------------------------------------------------------
# Kernel: the whole T-step recurrence in one invocation (no grid).
# ---------------------------------------------------------------------------
def rnn_seq_kernel(x_ref, h0_ref, wx_ref, wh_ref, b_ref, z_ref, *,
                   num_steps, hidden_size):
    # Loop invariants hoisted: one load each, one iota lane mask, all f32.
    wx = wx_ref[...]                                   # (I, P)
    wh = wh_ref[...]                                   # (P, P)
    b = b_ref[...]                                     # (1, P)
    h_slab = h0_ref[...].astype(jnp.float32)           # (Bp, P) full-lane carry
    col = lax.broadcasted_iota(jnp.int32, h_slab.shape, dimension=1)
    hid_mask = col < hidden_size                       # lanes [0,H) = hidden

    # num_steps is tiny and static -> straight-line unroll, all indices static.
    for t in range(num_steps):
        x = x_ref[t]                                                   # (Bp, I)
        z = (jnp.dot(x, wx, preferred_element_type=jnp.float32)
             + jnp.dot(h_slab, wh, preferred_element_type=jnp.float32)
             + b)                                                      # (Bp, P)
        # Numerically stable logsigmoid: min(z,0) - log1p(exp(-|z|)) (EUP).
        logsig = jnp.minimum(z, 0.0) - jnp.log1p(jnp.exp(-jnp.abs(z)))
        fused = jnp.where(hid_mask, z, logsig)         # lane-dense (Bp, P) slab
        z_ref[t] = fused.astype(z_ref.dtype)           # single unmasked store
        # Carry the FULL 128-lane slab: wh rows >= H are zero, so non-hidden
        # lanes contribute nothing next step -> no per-step sub-vreg slice.
        h_slab = z


# ---------------------------------------------------------------------------
# Wrappers
# ---------------------------------------------------------------------------
def _rnn_sequence_impl(xs, h0, wx, wh, b, *, hidden_size, output_size):
    T, B, I = xs.shape
    H, O = hidden_size, output_size
    P = wx.shape[1]

    Bp = max(8, _round_up(B, 8))                       # pad batch to 8 sublanes
    xsp = jnp.pad(xs, ((0, 0), (0, Bp - B), (0, 0)))   # (T, Bp, I)
    h0_slab = jnp.pad(h0, ((0, Bp - B), (0, P - H)))   # (Bp, P), zeros elsewhere

    vmem = lambda: pl.BlockSpec(memory_space=pltpu.VMEM)
    z = pl.pallas_call(
        functools.partial(rnn_seq_kernel, num_steps=T, hidden_size=H),
        out_shape=jax.ShapeDtypeStruct((T, Bp, P), xs.dtype),
        in_specs=[vmem() for _ in range(5)],
        out_specs=vmem(),
    )(xsp, h0_slab, wx, wh, b)

    outputs = z[:, :B, H:H + O]                        # (T, B, O)
    final_hidden = z[T - 1, :B, :H]                    # (B, H)
    return outputs, final_hidden


@functools.partial(jax.jit, static_argnames=("hidden_size", "output_size"))
def rnn_sequence(xs, h0, wx, wh, b, *, hidden_size, output_size):
    """xs: (T, B, I), h0: (B, H) -> (outputs (T, B, O), final hidden (B, H))."""
    return _rnn_sequence_impl(xs, h0, wx, wh, b,
                              hidden_size=hidden_size, output_size=output_size)


@functools.partial(jax.jit, static_argnames=("hidden_size", "output_size"))
def rnn_forward(x, h, wx, wh, b, *, hidden_size, output_size):
    """Single step, identical semantics to RNN.forward. Returns (output, hidden)."""
    outs, hid = _rnn_sequence_impl(x[None], h, wx, wh, b,
                                   hidden_size=hidden_size,
                                   output_size=output_size)
    return outs[0], hid


# ---------------------------------------------------------------------------
# Deterministic init mimicking nn.Linear defaults.
# ---------------------------------------------------------------------------
def _torch_linear_init(key, out_features, in_features):
    k_w, k_b = jax.random.split(key)
    bound = 1.0 / jnp.sqrt(jnp.float32(in_features))
    w = jax.random.uniform(k_w, (out_features, in_features),
                           minval=-bound, maxval=bound, dtype=jnp.float32)
    b = jax.random.uniform(k_b, (out_features,),
                           minval=-bound, maxval=bound, dtype=jnp.float32)
    return w, b


if __name__ == "__main__":
    # Small shapes consistent with the module: batch=2, input=16, hidden=32,
    # output=8, sequence length 8 for the fused-recurrence variant.
    B, I, H, O, T = 2, 16, 32, 8, 8

    key = jax.random.PRNGKey(0)
    k_x, k_seq, k_i2h, k_i2o = jax.random.split(key, 4)

    x = jax.random.normal(k_x, (B, I), dtype=jnp.float32)
    xs = jax.random.normal(k_seq, (T, B, I), dtype=jnp.float32)
    h0 = jnp.zeros((B, H), dtype=jnp.float32)          # initHidden() semantics

    w_i2h, b_i2h = _torch_linear_init(k_i2h, H, I + H)
    w_i2o, b_i2o = _torch_linear_init(k_i2o, O, I + H)

    # Hoisted one-time weight fusion + lane padding (never on the step path).
    wx, wh, b = prepare_weights(w_i2h, b_i2h, w_i2o, b_i2o, I, H)

    # --- single step (module forward) ------------------------------------
    out, hid = rnn_forward(x, h0, wx, wh, b, hidden_size=H, output_size=O)
    out, hid = jax.block_until_ready((out, hid))

    combined = jnp.concatenate([x, h0], axis=1)
    hid_ref = combined @ w_i2h.T + b_i2h
    out_ref = jax.nn.log_sigmoid(combined @ w_i2o.T + b_i2o)

    assert out.shape == (B, O) and hid.shape == (B, H)
    assert jnp.allclose(out, out_ref, atol=1e-5, rtol=1e-5)
    assert jnp.allclose(hid, hid_ref, atol=1e-5, rtol=1e-5)

    # --- full sequence in one pallas_call ---------------------------------
    outs, hid_T = rnn_sequence(xs, h0, wx, wh, b, hidden_size=H, output_size=O)
    outs, hid_T = jax.block_until_ready((outs, hid_T))

    h_r = h0
    outs_r = []
    for t in range(T):
        comb = jnp.concatenate([xs[t], h_r], axis=1)
        h_r = comb @ w_i2h.T + b_i2h
        outs_r.append(jax.nn.log_sigmoid(comb @ w_i2o.T + b_i2o))
    outs_r = jnp.stack(outs_r)

    assert outs.shape == (T, B, O) and hid_T.shape == (B, H)
    assert jnp.allclose(outs, outs_r, atol=1e-5, rtol=1e-5)
    assert jnp.allclose(hid_T, h_r, atol=1e-5, rtol=1e-5)

    print("KERNEL_OK")
</pallas_src>

<mosaic_0001>
module attributes {stable_mosaic.version = 11 : i64} {
  func.func @rnn_seq_kernel(%arg0: memref<1x8x16xf32, #tpu.memory_space<vmem>>, %arg1: memref<8x128xf32, #tpu.memory_space<vmem>>, %arg2: memref<16x128xf32, #tpu.memory_space<vmem>>, %arg3: memref<128x128xf32, #tpu.memory_space<vmem>>, %arg4: memref<1x128xf32, #tpu.memory_space<vmem>>, %arg5: memref<1x8x128xf32, #tpu.memory_space<vmem>>) attributes {dimension_semantics = [], scalar_prefetch = 0 : i64, scratch_operands = 0 : i64, tpu.core_type = #tpu.core_type<tc>} {
    %c0 = arith.constant 0 : index
    %c0_0 = arith.constant 0 : index
    %0 = vector.load %arg2[%c0, %c0_0] : memref<16x128xf32, #tpu.memory_space<vmem>>, vector<16x128xf32>
    %c0_1 = arith.constant 0 : index
    %c0_2 = arith.constant 0 : index
    %1 = vector.load %arg3[%c0_1, %c0_2] : memref<128x128xf32, #tpu.memory_space<vmem>>, vector<128x128xf32>
    %c0_3 = arith.constant 0 : index
    %c0_4 = arith.constant 0 : index
    %2 = vector.load %arg4[%c0_3, %c0_4] : memref<1x128xf32, #tpu.memory_space<vmem>>, vector<1x128xf32>
    %c0_5 = arith.constant 0 : index
    %c0_6 = arith.constant 0 : index
    %3 = vector.load %arg1[%c0_5, %c0_6] : memref<8x128xf32, #tpu.memory_space<vmem>>, vector<8x128xf32>
    %4 = tpu.iota {dimensions = array<i32: 1>} : vector<8x128xi32>
    %c32_i32 = arith.constant 32 : i32
    %5 = vector.broadcast %c32_i32 : i32 to vector<8x128xi32>
    %6 = arith.cmpi slt, %4, %5 : vector<8x128xi32>
    %c0_7 = arith.constant 0 : index
    %c0_8 = arith.constant 0 : index
    %c0_9 = arith.constant 0 : index
    %7 = vector.load %arg0[%c0_7, %c0_8, %c0_9] : memref<1x8x16xf32, #tpu.memory_space<vmem>>, vector<1x8x16xf32>
    %8 = vector.shape_cast %7 : vector<1x8x16xf32> to vector<8x16xf32>
    %cst = arith.constant dense<0.000000e+00> : vector<8x128xf32>
    %9 = tpu.matmul %8, %0, %cst {dimension_numbers = #tpu.dot_dimension_numbers<[1], [0], [0], [1], [0, 0, 1, 1], [], []>} : vector<8x16xf32>, vector<16x128xf32>, vector<8x128xf32> -> vector<8x128xf32>
    %cst_10 = arith.constant dense<0.000000e+00> : vector<8x128xf32>
    %10 = tpu.matmul %3, %1, %cst_10 {dimension_numbers = #tpu.dot_dimension_numbers<[1], [0], [0], [1], [0, 0, 1, 1], [], []>} : vector<8x128xf32>, vector<128x128xf32>, vector<8x128xf32> -> vector<8x128xf32>
    %11 = arith.addf %9, %10 : vector<8x128xf32>
    %12 = vector.broadcast %2 : vector<1x128xf32> to vector<8x128xf32>
    %13 = arith.addf %11, %12 : vector<8x128xf32>
    %cst_11 = arith.constant 0.000000e+00 : f32
    %14 = vector.broadcast %cst_11 : f32 to vector<8x128xf32>
    %15 = arith.minimumf %13, %14 : vector<8x128xf32>
    %16 = math.absf %13 : vector<8x128xf32>
    %cst_12 = arith.constant 0.000000e+00 : f32
    %17 = vector.broadcast %cst_12 : f32 to vector<8x128xf32>
    %18 = arith.subf %17, %16 : vector<8x128xf32>
    %19 = math.exp %18 : vector<8x128xf32>
    %20 = math.log1p %19 : vector<8x128xf32>
    %21 = arith.subf %15, %20 : vector<8x128xf32>
    %22 = arith.select %6, %13, %21 : vector<8x128xi1>, vector<8x128xf32>
    %c0_13 = arith.constant 0 : index
    %c0_14 = arith.constant 0 : index
    %c0_15 = arith.constant 0 : index
    %23 = vector.load %arg5[%c0_13, %c0_14, %c0_15] : memref<1x8x128xf32, #tpu.memory_space<vmem>>, vector<1x8x128xf32>
    %24 = vector.shape_cast %23 : vector<1x8x128xf32> to vector<8x128xf32>
    %25 = vector.shape_cast %22 : vector<8x128xf32> to vector<1x8x128xf32>
    tpu.vector_store %arg5[%c0_13, %c0_14, %c0_15], %25 {strides = array<i32>} : memref<1x8x128xf32, #tpu.memory_space<vmem>>, vector<1x8x128xf32>,
    return
  }
}

</mosaic_0001>

<bundles_post_ra>
// kernel: rnn_forward.1
= control target key start
LH: loop header
LB: loop body
LE: loop exit
PB: predicated region body
PF: predicated region fallthrough
CT: control target
= control target key end

     0   :  { %10 = vsyncpa [#allocation3], 0  ;;  %s356_s18 = smov [#allocation2]   ;;  %s422_s0 = inlined_call_operand.vmem [shape: f32[1,8,16], index: 0, kind: input, shape index: {}]   ;;  %s423_s1 = inlined_call_operand.vmem [shape: f32[8,128], index: 1, kind: input, shape index: {}]   ;;  %s424_s2 = inlined_call_operand.vmem [shape: f32[16,128], index: 2, kind: input, shape index: {}]   ;;  %s425_s3 = inlined_call_operand.hbm [shape: f32[128,128], index: 3, kind: input, shape index: {}]   ;;  %s426_s4 = inlined_call_operand.vmem [shape: f32[1,128], index: 4, kind: input, shape index: {}]   ;;  %s427_s5 = inlined_call_operand.vmem [shape: f32[1,8,128], index: 5, kind: output, shape index: {}]  }
   0x1   :  { %s22_s19 = sshll.u32 %s356_s18, 4  ;;  %s332_s22 = scalar_lea.hbm %s425_s3, 2048  ;;  %s23_s19 = int_to_ptr.vmem [resolvable:$true] %s22_s19 }
   0x2   :  { %p333_p0 = scmp.ne.s32.totalorder %s425_s3, %s332_s22  ;;  %p336_p1 = scmp.lt.u32.totalorder %s332_s22, %s425_s3 }
   0x4   :  { %p338_p2 = pnand %p336_p1, %p333_p0 }
   0x6   :  { %341 = shalt.err (!%p338_p2)
}
   0x7   :  { %s342_s27 = scalar_lea.vmem %s23_s19, 2048  ;;  %p347_p4 = scmp.lt.s32.totalorder %s23_s19, %s23_s19 }
   0x8   :  { %p343_p3 = scmp.ne.s32.totalorder %s23_s19, %s342_s27  ;;  %p348_p5 = scmp.lt.s32.totalorder %s342_s27, %s342_s27 }
   0xa   :  { %p349_p6 = por %p348_p5, %p347_p4 }
   0xc   :  { %p350_p7 = pnand %p349_p6, %p343_p3 }
   0xe   :  { %353 = shalt.err (!%p350_p7)
}
   0xf   :  { %s357_s28 = smov 128   ;;  %s358_s29 = smov 8  }
  0x10   :  { %28 = dma.hbm_to_vmem [thread:$0]  %s425_s3, 2048, %s23_s19, [#allocation3], %s357_s28, %s357_s28, %s358_s29  }
  0x11   :  { %354 = dma.done.wait [#allocation3], 2048  }
  0x12   :  { %355 = vsyncadd [#allocation3], 4294965248  ;;  %v359_v0 = vmov 0.0|0.0   ;;  %vm360_vm0 = vmmov 0   ;;  %v361_v1 = vmov 0.0   ;;  %v36_v2 = vld [vmem:[#allocation2] sm:$0xff]  ;;  %v54_v44 = vlaneseq }
  0x13   :  { %295 = vmatprep.subr.bf16.mxu0 %v359_v0  ;;  %319 = vmatprep.subr.bf16.mxu1 %v359_v0  ;;  %v37_v3 = vld [vmem:[#allocation2 + $0x8] sm:$0xff]  ;;  %v38_v4 = vld [vmem:[#allocation2 + $0x10] sm:$0xff]  ;;  %v39_v6 = vld [vmem:[#allocation2 + $0x18] sm:$0xff]  ;;  %vm128_vm1 = vcmask 130048  }
  0x14   :  { %292 = vmatprep.mubr.msk.f32.mxu1 %vm360_vm0, %v361_v1  ;;  %285 = vmatprep.mubr.msk.f32.mxu0 %vm360_vm0, %v361_v1  ;;  %v296_v5 = vpack.c.bf16 %v37_v3, %v36_v2  ;;  %v299_v7 = vpack.c.bf16 %v39_v6, %v38_v4  ;;  %v40_v8 = vld [vmem:[#allocation2 + $0x20] sm:$0xff]  ;;  %v41_v9 = vld [vmem:[#allocation2 + $0x28] sm:$0xff]  ;;  %v42_v14 = vld [vmem:[#allocation2 + $0x30] sm:$0xff]  ;;  %v55_v47 = vand.u32 127, %v54_v44 }
  0x15   :  { %v34_v10 = vld [vmem:[%s424_s2] sm:$0xff]  ;;  %v35_v11 = vld [vmem:[%s424_s2 + $0x8] sm:$0xff]  ;;  %v302_v13 = vpack.c.bf16 %v41_v9, %v40_v8  ;;  %v43_v15 = vld [vmem:[#allocation2 + $0x38] sm:$0xff] }
  0x16   :  { %297 = vmatpush3.bf16.msra.mxu0 %v296_v5  ;;  %v320_v12 = vpack.c.bf16 %v35_v11, %v34_v10  ;;  %v57_v16 = vld [vmem:[%s422_s0] sm:$0xff]  ;;  %v305_v17 = vpack.c.bf16 %v43_v15, %v42_v14  ;;  %v45_v19 = vld [vmem:[#allocation2 + $0x48] sm:$0xff]  ;;  %v46_v21 = vld [vmem:[#allocation2 + $0x50] sm:$0xff]  ;;  %vm56_vm3 = vcmp.lt.s32.totalorder %v55_v47, 32 }
  0x17   :  { %298 = vmatprep.subr.bf16.mxu0 %v359_v0  ;;  %v44_v18 = vld [vmem:[#allocation2 + $0x40] sm:$0xff]  ;;  %v47_v22 = vld [vmem:[#allocation2 + $0x58] sm:$0xff]  ;;  %v49_v25 = vld [vmem:[#allocation2 + $0x68] sm:$0xff] }
  0x18   :  { %321 = vmatpush3.bf16.msra.mxu1 %v320_v12  ;;  %v308_v20 = vpack.c.bf16 %v45_v19, %v44_v18  ;;  %v311_v23 = vpack.c.bf16 %v47_v22, %v46_v21  ;;  %v48_v24 = vld [vmem:[#allocation2 + $0x60] sm:$0xff]  ;;  %v50_v27 = vld [vmem:[#allocation2 + $0x70] sm:$0xff]  ;;  %v51_v28 = vld [vmem:[#allocation2 + $0x78] sm:$0xff] }
  0x19   :  { %v314_v26 = vpack.c.bf16 %v49_v25, %v48_v24  ;;  %v317_v29 = vpack.c.bf16 %v51_v28, %v50_v27  ;;  %v53_v30 = vld [vmem:[%s423_s1] sm:$0xff] }
  0x1a   :  { %300 = vmatpush3.bf16.msra.mxu0 %v299_v7  ;;  %v232_v33 = vld [vmem:[%s426_s4] ss:$0 sm:$0xff] }
  0x1b   :  { %301 = vmatprep.subr.bf16.mxu0 %v359_v0  ;;  %293 = vmatmul.mubr.msk.f32.vlgmr.msra.gmra.mrb[0].mxu1 %vm128_vm1, %v57_v16 }
  0x1e   :  { %303 = vmatpush3.bf16.msra.mxu0 %v302_v13 }
  0x1f   :  { %304 = vmatprep.subr.bf16.mxu0 %v359_v0 }
  0x22   :  { %306 = vmatpush3.bf16.msra.mxu0 %v305_v17 }
  0x23   :  { %307 = vmatprep.subr.bf16.mxu0 %v359_v0 }
  0x26   :  { %309 = vmatpush3.bf16.msra.mxu0 %v308_v20 }
  0x27   :  { %310 = vmatprep.subr.bf16.mxu0 %v359_v0 }
  0x2a   :  { %312 = vmatpush3.bf16.msra.mxu0 %v311_v23 }
  0x2b   :  { %313 = vmatprep.subr.bf16.mxu0 %v359_v0 }
  0x2e   :  { %315 = vmatpush3.bf16.msra.mxu0 %v314_v26 }
  0x2f   :  { %316 = vmatprep.subr.bf16.mxu0 %v359_v0 }
  0x32   :  { %318 = vmatpush3.bf16.msra.mxu0 %v317_v29 }
  0x35   :  { %286 = vmatmul.mubr.f32.vlgmr.msra.gmra.mrb[0].mxu0 %v53_v30 }
  0xee   :  { %v198_v31 = vpop.f32.mrb[0].mxu1 }
  0xef   :  { %v294_v32 = vpop.f32.mrb[1].mxu1 }
 0x108   :  { %v124_v34 = vpop.f32.mrb[0].mxu0 }
 0x109   :  { %v199_v35 = vadd.f32 %v198_v31, %v124_v34  ;;  %v287_v36 = vpop.f32.mrb[1].mxu0 }
 0x10b   :  { %v208_v37 = vadd.f32 %v232_v33, %v199_v35 }
 0x10d   :  { %v210_v38 = vand.u32 2147483647, %v208_v37  ;;  %v209_v51 = vmin.f32 %v208_v37, 0.0 }
 0x10f   :  { %v211_v39 = vsub.f32 0.0, %v210_v38 }
 0x111   :  { %v212_v40 = vmul.f32 1.442695, %v211_v39 }
 0x113   :  { %328 = vpow2.f32 %v212_v40 }
 0x11d   :  { %v329_v41 = vpop.eup %328 }
 0x11e   :  { %v214_v42 = vadd.f32 1.0, %v329_v41  ;;  %v217_v43 = vmul.f32 -0.5, %v329_v41  ;;  %v220_v46 = vand.u32 2147483647, %v329_v41 }
 0x120   :  { %330 = vlog2.f32 %v214_v42  ;;  %v218_v45 = vadd.f32 1.0, %v217_v43  ;;  %vm221_vm2 = vcmp.lt.f32.partialorder %v220_v46, 0.0004427343 }
 0x122   :  { %v219_v50 = vmul.f32 %v329_v41, %v218_v45 }
 0x12a   :  { %v331_v48 = vpop.eup %330 }
 0x12b   :  { %v216_v49 = vmul.f32 0.6931472, %v331_v48 }
 0x12d   :  { %v222_v52 = vsel %vm221_vm2, %v219_v50, %v216_v49 }
 0x12e   :  { %v223_v53 = vsub.f32 %v209_v51, %v222_v52 }
 0x130   :  { %v224_v54 = vsel %vm56_vm3, %v208_v37, %v223_v53 }
 0x131   :  { %225 = vst [vmem:[%s427_s5] sm:$0xff] %v224_v54 }
 0x132   :  { %230 = vsyncpa [#allocation3], 1 }

</bundles_post_ra>
